<compile_context>
chip_gen: v5e
topology: v5e:2x2
jax: 0.10.0
libtpu: 0.0.40
codegen_flags: <defaults>
</compile_context>

<pallas_src>
import functools

import jax
import jax.numpy as jnp
from jax import lax
from jax.experimental import pallas as pl
from jax.experimental.pallas import tpu as pltpu

LANE = 128


def _round_up(n: int, m: int) -> int:
    return ((n + m - 1) // m) * m


def _vmem_capacity_bytes() -> int:
    """Physical VMEM of the local TPU generation (trace-time query)."""
    try:
        cap = int(getattr(pltpu.get_tpu_info(), "vmem_capacity_bytes", 0))
        if cap > 0:
            return cap
    except Exception:
        pass
    return 64 << 20  # conservative default (v7x); v5e/v6e have 128 MiB.


def _choose_block_d(B: int, D: int, itemsize: int) -> int:
    """Feature-stripe width TD, sized from the real per-stripe VMEM footprint."""
    if D <= LANE:
        return D  # single full-width block (block dim == array dim, no 128 rule)

    Dp = _round_up(D, LANE)

    budget = max(_vmem_capacity_bytes() - (16 << 20), 8 << 20)
    # Live bytes per feature column: double-buffered x-in + y-out stripes plus
    # ~3 f32 (B, TD) temporaries (f32 cast / diff / pre-cast y) in the body.
    per_col = B * (4 * itemsize + 3 * 4) + 9 * 4
    td_fit = max((budget // per_col) // LANE * LANE, LANE)

    # Bandwidth floor: keep each x stripe >= ~2 MiB so DMAs run near the HBM
    # roofline and the ~0.35 us per-grid-step fixed cost stays amortized.
    td_bw = _round_up(max((2 << 20) // max(B * itemsize, 1), LANE), LANE)

    # Pipelining / megacore: prefer >= 4 stripes when D is large enough so
    # v7x's two TensorCores both run and in/out DMA overlaps across steps.
    td_split = _round_up(pl.cdiv(Dp, 4), LANE)

    td = max(min(td_fit, max(td_split, td_bw)), LANE)
    return min(td, Dp)


def make_batchnorm_kernel(momentum: float, eps: float):
    """One feature stripe: batch stats + affine + log|det J| + running update."""

    def kernel(x_ref, params_ref, run_ref, y_ref, ladj_ref, new_run_ref):
        x = x_ref[...].astype(jnp.float32)                 # (B, TD)
        B = x.shape[0]
        inv_nm1 = 1.0 / (B - 1) if B > 1 else float("nan")  # torch.var is unbiased

        # Batch statistics (torch.var default: unbiased -> /(B-1)).
        mean = jnp.mean(x, axis=0, keepdims=True)          # (1, TD)
        diff = x - mean                                    # only (B, TD) temp kept live
        var = jnp.sum(diff * diff, axis=0, keepdims=True) * inv_nm1
        inv_std = lax.rsqrt(var + eps)                     # EUP slot (free-ish)

        log_gamma = params_ref[0:1, :]                     # (1, TD)
        beta = params_ref[1:2, :]                          # (1, TD)
        y = jnp.exp(log_gamma) * (diff * inv_std) + beta
        y_ref[...] = y.astype(y_ref.dtype)

        # Per-feature log|det J| row; (B, D) broadcast is left to the caller.
        ladj_ref[...] = (log_gamma - 0.5 * jnp.log(var + eps)).astype(ladj_ref.dtype)

        # Running-stat update (the buffer mutation of the torch module):
        # row 0 = running_mean, row 1 = running_var.
        new_run_ref[0:1, :] = (momentum * run_ref[0:1, :]
                               + (1.0 - momentum) * mean).astype(new_run_ref.dtype)
        new_run_ref[1:2, :] = (momentum * run_ref[1:2, :]
                               + (1.0 - momentum) * var).astype(new_run_ref.dtype)

    return kernel


@functools.partial(jax.jit, static_argnames=("momentum", "eps", "block_d"))
def batchnorm_forward(x, log_gamma, beta, running_mean, running_var,
                      momentum=0.9, eps=1e-5, block_d=None):
    """Training-mode forward of the RealNVP BatchNorm layer.

    Returns (y, ladj_row, new_running_mean, new_running_var) where y is (B, D),
    ladj_row is (D,) (constant over the batch; broadcast lazily to x.shape by
    the consumer, matching `log_abs_det_jacobian.expand_as(x)`), and the
    running stats are (D,).  Note: B == 1 yields NaN variance, same as
    torch.var(unbiased=True) on a single sample.
    """
    B, D = x.shape
    itemsize = x.dtype.itemsize

    if block_d is None:
        TD = _choose_block_d(B, D, itemsize)
    else:
        TD = D if D <= LANE else min(_round_up(block_d, LANE), _round_up(D, LANE))
    n_d = pl.cdiv(D, TD)

    # Fused tiny row operands: params = [log_gamma; beta], run = [mean; var].
    params = jnp.stack([log_gamma, beta]).astype(jnp.float32)          # (2, D)
    run = jnp.stack([running_mean, running_var]).astype(jnp.float32)   # (2, D)

    kernel = make_batchnorm_kernel(float(momentum), float(eps))

    x_spec = pl.BlockSpec((B, TD), lambda j: (0, j))
    row1_spec = pl.BlockSpec((1, TD), lambda j: (0, j))
    row2_spec = pl.BlockSpec((2, TD), lambda j: (0, j))

    # VMEM limit from the actual live footprint (double-buffered x/y stripes,
    # in-body f32 temporaries, fused rows) with headroom below physical VMEM.
    cap = _vmem_capacity_bytes()
    stripe = B * TD * itemsize
    footprint = 4 * stripe + 3 * B * TD * 4 + 10 * TD * 4 + (2 << 20)
    vmem_limit = int(min(max(footprint, 16 << 20), cap - (4 << 20)))

    # TODO(synk): for very large B (where a single (B, TD) stripe exceeds the
    # VMEM budget even at TD=128), add a second "arbitrary" grid axis over the
    # batch with sum / sum-of-squares accumulation in VMEM scratch followed by
    # a normalize pass; MAF-style shapes fit in one batch tile.
    y, ladj, new_run = pl.pallas_call(
        kernel,
        grid=(n_d,),
        out_shape=(
            jax.ShapeDtypeStruct((B, D), x.dtype),        # y
            jax.ShapeDtypeStruct((1, D), jnp.float32),    # log|det J| row
            jax.ShapeDtypeStruct((2, D), jnp.float32),    # new running stats
        ),
        in_specs=[x_spec, row2_spec, row2_spec],
        out_specs=(x_spec, row1_spec, row2_spec),
        input_output_aliases={2: 2},                       # in-place running stats
        compiler_params=pltpu.CompilerParams(
            dimension_semantics=("parallel",),
            vmem_limit_bytes=vmem_limit),
    )(x, params, run)

    return y, ladj[0], new_run[0], new_run[1]


if __name__ == "__main__":
    key = jax.random.PRNGKey(0)
    momentum, eps = 0.9, 1e-5

    def reference(x, log_gamma, beta, running_mean, running_var):
        # pure-JAX mirror of the torch forward in training mode
        mean = x.mean(0)
        var = x.var(0, ddof=1)
        x_hat = (x - mean) / jnp.sqrt(var + eps)
        y = jnp.exp(log_gamma) * x_hat + beta
        ladj = log_gamma - 0.5 * jnp.log(var + eps)
        rm = momentum * running_mean + (1 - momentum) * mean
        rv = momentum * running_var + (1 - momentum) * var
        return y, ladj, rm, rv

    ok = True
    # (16, 32): single full-width block; (8, 200): lane-padded boundary block path.
    for (B, D) in [(16, 32), (8, 200)]:
        key, k1, k2, k3 = jax.random.split(key, 4)
        x = jax.random.normal(k1, (B, D), dtype=jnp.float32) * 2.0 + 0.5
        log_gamma = 0.1 * jax.random.normal(k2, (D,), dtype=jnp.float32)
        beta = 0.1 * jax.random.normal(k3, (D,), dtype=jnp.float32)
        running_mean = jnp.zeros((D,), jnp.float32)
        running_var = jnp.ones((D,), jnp.float32)

        y, ladj_row, new_rm, new_rv = batchnorm_forward(
            x, log_gamma, beta, running_mean, running_var,
            momentum=momentum, eps=eps)
        jax.block_until_ready((y, ladj_row, new_rm, new_rv))

        y_ref, ladj_ref, rm_ref, rv_ref = reference(
            x, log_gamma, beta, running_mean, running_var)

        ok &= bool(jnp.allclose(y, y_ref, atol=1e-5, rtol=1e-5))
        ok &= bool(jnp.allclose(ladj_row, ladj_ref, atol=1e-5, rtol=1e-5))
        # module returns log|det J| expanded to x's shape; broadcast is consumer-side
        ok &= bool(jnp.allclose(jnp.broadcast_to(ladj_row, x.shape),
                                jnp.broadcast_to(ladj_ref, x.shape),
                                atol=1e-5, rtol=1e-5))
        ok &= bool(jnp.allclose(new_rm, rm_ref, atol=1e-5, rtol=1e-5))
        ok &= bool(jnp.allclose(new_rv, rv_ref, atol=1e-5, rtol=1e-5))

    assert ok
    print("KERNEL_OK")
</pallas_src>

<mosaic_0001>
module attributes {stable_mosaic.version = 11 : i64} {
  func.func @kernel(%arg0: i32, %arg1: memref<16x32xf32, #tpu.memory_space<vmem>>, %arg2: memref<2x32xf32, #tpu.memory_space<vmem>>, %arg3: memref<2x32xf32, #tpu.memory_space<vmem>>, %arg4: memref<16x32xf32, #tpu.memory_space<vmem>>, %arg5: memref<1x32xf32, #tpu.memory_space<vmem>>, %arg6: memref<2x32xf32, #tpu.memory_space<vmem>>) attributes {dimension_semantics = [#tpu.dimension_semantics<parallel>], iteration_bounds = array<i64: 1>, scalar_prefetch = 0 : i64, scratch_operands = 0 : i64, tpu.core_type = #tpu.core_type<tc>, window_params = [{transform_indices = @transform_0, window_bounds = array<i64: 16, 32>}, {transform_indices = @transform_1, window_bounds = array<i64: 2, 32>}, {transform_indices = @transform_2, window_bounds = array<i64: 2, 32>}, {transform_indices = @transform_3, window_bounds = array<i64: 16, 32>}, {transform_indices = @transform_4, window_bounds = array<i64: 1, 32>}, {transform_indices = @transform_5, window_bounds = array<i64: 2, 32>}]} {
    %c0 = arith.constant 0 : index
    %c0_0 = arith.constant 0 : index
    %0 = vector.load %arg1[%c0, %c0_0] : memref<16x32xf32, #tpu.memory_space<vmem>>, vector<16x32xf32>
    %cst = arith.constant dense<0.000000e+00> : vector<32xf32>
    %1 = vector.multi_reduction <add>, %0, %cst [0] : vector<16x32xf32> to vector<32xf32>
    %2 = vector.shape_cast %1 : vector<32xf32> to vector<1x32xf32>
    %cst_1 = arith.constant 1.600000e+01 : f32
    %3 = vector.broadcast %cst_1 : f32 to vector<1x32xf32>
    %4 = arith.divf %2, %3 : vector<1x32xf32>
    %5 = vector.broadcast %4 : vector<1x32xf32> to vector<16x32xf32>
    %6 = arith.subf %0, %5 : vector<16x32xf32>
    %7 = arith.mulf %6, %6 : vector<16x32xf32>
    %cst_2 = arith.constant dense<0.000000e+00> : vector<32xf32>
    %8 = vector.multi_reduction <add>, %7, %cst_2 [0] : vector<16x32xf32> to vector<32xf32>
    %9 = vector.shape_cast %8 : vector<32xf32> to vector<1x32xf32>
    %cst_3 = arith.constant 0.0666666701 : f32
    %10 = vector.broadcast %cst_3 : f32 to vector<1x32xf32>
    %11 = arith.mulf %9, %10 : vector<1x32xf32>
    %cst_4 = arith.constant 9.99999974E-6 : f32
    %12 = vector.broadcast %cst_4 : f32 to vector<1x32xf32>
    %13 = arith.addf %11, %12 : vector<1x32xf32>
    %14 = math.rsqrt %13 : vector<1x32xf32>
    %c0_5 = arith.constant 0 : index
    %c0_6 = arith.constant 0 : index
    %15 = vector.load %arg2[%c0_5, %c0_6] : memref<2x32xf32, #tpu.memory_space<vmem>>, vector<1x32xf32>
    %c1 = arith.constant 1 : index
    %c0_7 = arith.constant 0 : index
    %16 = vector.load %arg2[%c1, %c0_7] : memref<2x32xf32, #tpu.memory_space<vmem>>, vector<1x32xf32>
    %17 = math.exp %15 : vector<1x32xf32>
    %18 = vector.broadcast %14 : vector<1x32xf32> to vector<16x32xf32>
    %19 = arith.mulf %6, %18 : vector<16x32xf32>
    %20 = vector.broadcast %17 : vector<1x32xf32> to vector<16x32xf32>
    %21 = arith.mulf %20, %19 : vector<16x32xf32>
    %22 = vector.broadcast %16 : vector<1x32xf32> to vector<16x32xf32>
    %23 = arith.addf %21, %22 : vector<16x32xf32>
    %c0_8 = arith.constant 0 : index
    %c0_9 = arith.constant 0 : index
    %24 = vector.load %arg4[%c0_8, %c0_9] : memref<16x32xf32, #tpu.memory_space<vmem>>, vector<16x32xf32>
    tpu.vector_store %arg4[%c0_8, %c0_9], %23 {strides = array<i32>} : memref<16x32xf32, #tpu.memory_space<vmem>>, vector<16x32xf32>,
    %cst_10 = arith.constant 9.99999974E-6 : f32
    %25 = vector.broadcast %cst_10 : f32 to vector<1x32xf32>
    %26 = arith.addf %11, %25 : vector<1x32xf32>
    %27 = math.log %26 : vector<1x32xf32>
    %cst_11 = arith.constant 5.000000e-01 : f32
    %28 = vector.broadcast %cst_11 : f32 to vector<1x32xf32>
    %29 = arith.mulf %28, %27 : vector<1x32xf32>
    %30 = arith.subf %15, %29 : vector<1x32xf32>
    %c0_12 = arith.constant 0 : index
    %c0_13 = arith.constant 0 : index
    %31 = vector.load %arg5[%c0_12, %c0_13] : memref<1x32xf32, #tpu.memory_space<vmem>>, vector<1x32xf32>
    tpu.vector_store %arg5[%c0_12, %c0_13], %30 {strides = array<i32>} : memref<1x32xf32, #tpu.memory_space<vmem>>, vector<1x32xf32>,
    %c0_14 = arith.constant 0 : index
    %c0_15 = arith.constant 0 : index
    %32 = vector.load %arg3[%c0_14, %c0_15] : memref<2x32xf32, #tpu.memory_space<vmem>>, vector<1x32xf32>
    %cst_16 = arith.constant 0.899999976 : f32
    %33 = vector.broadcast %cst_16 : f32 to vector<1x32xf32>
    %34 = arith.mulf %33, %32 : vector<1x32xf32>
    %cst_17 = arith.constant 1.000000e-01 : f32
    %35 = vector.broadcast %cst_17 : f32 to vector<1x32xf32>
    %36 = arith.mulf %35, %4 : vector<1x32xf32>
    %37 = arith.addf %34, %36 : vector<1x32xf32>
    %c0_18 = arith.constant 0 : index
    %c0_19 = arith.constant 0 : index
    %38 = vector.load %arg6[%c0_18, %c0_19] : memref<2x32xf32, #tpu.memory_space<vmem>>, vector<1x32xf32>
    tpu.vector_store %arg6[%c0_18, %c0_19], %37 {strides = array<i32>} : memref<2x32xf32, #tpu.memory_space<vmem>>, vector<1x32xf32>,
    %c1_20 = arith.constant 1 : index
    %c0_21 = arith.constant 0 : index
    %39 = vector.load %arg3[%c1_20, %c0_21] : memref<2x32xf32, #tpu.memory_space<vmem>>, vector<1x32xf32>
    %cst_22 = arith.constant 0.899999976 : f32
    %40 = vector.broadcast %cst_22 : f32 to vector<1x32xf32>
    %41 = arith.mulf %40, %39 : vector<1x32xf32>
    %cst_23 = arith.constant 1.000000e-01 : f32
    %42 = vector.broadcast %cst_23 : f32 to vector<1x32xf32>
    %43 = arith.mulf %42, %11 : vector<1x32xf32>
    %44 = arith.addf %41, %43 : vector<1x32xf32>
    %c1_24 = arith.constant 1 : index
    %c0_25 = arith.constant 0 : index
    %45 = vector.load %arg6[%c1_24, %c0_25] : memref<2x32xf32, #tpu.memory_space<vmem>>, vector<1x32xf32>
    tpu.vector_store %arg6[%c1_24, %c0_25], %44 {strides = array<i32>} : memref<2x32xf32, #tpu.memory_space<vmem>>, vector<1x32xf32>,
    return
  }
  func.func @transform_0(%arg0: i32) -> (i32, i32) {
    %c0_i32 = arith.constant 0 : i32
    %c0_i32_0 = arith.constant 0 : i32
    return %c0_i32, %arg0 : i32, i32
  }
  func.func @transform_1(%arg0: i32) -> (i32, i32) {
    %c0_i32 = arith.constant 0 : i32
    %c0_i32_0 = arith.constant 0 : i32
    return %c0_i32, %arg0 : i32, i32
  }
  func.func @transform_2(%arg0: i32) -> (i32, i32) {
    %c0_i32 = arith.constant 0 : i32
    %c0_i32_0 = arith.constant 0 : i32
    return %c0_i32, %arg0 : i32, i32
  }
  func.func @transform_3(%arg0: i32) -> (i32, i32) {
    %c0_i32 = arith.constant 0 : i32
    %c0_i32_0 = arith.constant 0 : i32
    return %c0_i32, %arg0 : i32, i32
  }
  func.func @transform_4(%arg0: i32) -> (i32, i32) {
    %c0_i32 = arith.constant 0 : i32
    %c0_i32_0 = arith.constant 0 : i32
    return %c0_i32, %arg0 : i32, i32
  }
  func.func @transform_5(%arg0: i32) -> (i32, i32) {
    %c0_i32 = arith.constant 0 : i32
    %c0_i32_0 = arith.constant 0 : i32
    return %c0_i32, %arg0 : i32, i32
  }
}

</mosaic_0001>

<bundles_post_ra>
// kernel: batchnorm_forward.1
= control target key start
LH: loop header
LB: loop body
LE: loop exit
PB: predicated region body
PF: predicated region fallthrough
CT: control target
= control target key end

     0   :  { %11 = vsyncpa [#allocation3], 0  ;;  %s320_s0 = inlined_call_operand.hbm [shape: f32[16,32], index: 0, kind: input, shape index: {}]   ;;  %s321_s1 = inlined_call_operand.vmem [shape: f32[2,32], index: 1, kind: input, shape index: {}]   ;;  %s322_s2 = inlined_call_operand.vmem [shape: f32[2,32], index: 2, kind: input, shape index: {}, may-alias: {2,5}]   ;;  %s323_s3 = inlined_call_operand.hbm [shape: f32[16,32], index: 3, kind: output, shape index: {0}]   ;;  %s324_s4 = inlined_call_operand.hbm [shape: f32[1,32], index: 4, kind: output, shape index: {1}]   ;;  %s325_s5 = inlined_call_operand.vmem [shape: f32[2,32], index: 5, kind: output, shape index: {2}, may-alias: {2,5}]  }
   0x1   :  { %12 = vsyncpa [#allocation4], 0 }
   0x2   :  { %13 = vsyncpa [#allocation7], 0  ;;  %s18_s20 = sshll.u32 %s320_s0, 4  ;;  %s242_s21 = smov [#allocation2]   ;;  %s19_s20 = int_to_ptr.hbm [resolvable:$true] %s18_s20 }
   0x3   :  { %s20_s22 = sshll.u32 %s242_s21, 4  ;;  %s243_s23 = smov 128   ;;  %s21_s22 = int_to_ptr.vmem [resolvable:$true] %s20_s22 }
   0x4   :  { %s244_s24 = smov 8  }
   0x5   :  { %26 = dma.hbm_to_vmem [thread:$0]  %s19_s20, 256, %s21_s22, [#allocation3], %s243_s23, %s243_s23, %s244_s24  }
   0x6   :  { %236 = dma.done.wait [#allocation3], 256  }
   0x7   :  { %237 = vsyncadd [#allocation3], 4294967040  ;;  %v245_v0 = vmov 16.0   ;;  %vm37_vm0 = vcmask 261120   ;;  %v35_v2 = vld [vmem:[#allocation2] sm:$0xff]  ;;  %v36_v3 = vld [vmem:[#allocation2 + $0x8] sm:$0xff] }
   0x8   :  { %156 = vrcp.f32 %v245_v0  ;;  %v38_v4 = vsel %vm37_vm0, %v35_v2, 0.0  ;;  %v39_v5 = vsel %vm37_vm0, %v36_v3, 0.0  ;;  %v100_v29 = vld [vmem:[%s322_s2] sm:$0x1]  ;;  %vm98_vm2 = vcmask 253952   ;;  %s246_s8 = smov [#allocation6]  }
   0x9   :  { %v40_v7 = vadd.f32 %v39_v5, %v38_v4  ;;  %v101_v31 = vmul.f32 0.9, %v100_v29  ;;  %v105_v35 = vld [vmem:[%s322_s2 + $0x1] sm:$0x1]  ;;  %v80_v41 = vld [vmem:[%s321_s1] sm:$0x1] }
   0xa   :  { %v106_v38 = vmul.f32 0.9, %v105_v35  ;;  %v82_v43 = vmul.f32 1.442695, %v80_v41  ;;  %s128_s9 = sshll.u32 %s246_s8, 4  ;;  %s130_s12 = sshll.u32 %s324_s4, 4  ;;  %s129_s9 = int_to_ptr.vmem [resolvable:$true] %s128_s9  ;;  %s131_s12 = int_to_ptr.hbm [resolvable:$true] %s130_s12 }
   0xb   :  { %v41_v9 = vrot.slane %v40_v7, 4  ;;  %v155_v58 = vld [vmem:[%s321_s1 + $0x1] ss:$0 sm:$0xff]  ;;  %s247_s4 = smov [#allocation5]   ;;  %s116_s17 = sshll.u32 %s323_s3, 4  ;;  %s117_s17 = int_to_ptr.hbm [resolvable:$true] %s116_s17 }
   0xc   :  { %s114_s14 = sshll.u32 %s247_s4, 4  ;;  %s115_s14 = int_to_ptr.vmem [resolvable:$true] %s114_s14 }
   0xd   :  { %v42_v11 = vadd.f32 %v41_v9, %v40_v7 }
   0xe   :  { %v157_v1 = vpop.eup %156 }
   0xf   :  { %v48_v6 = vmul.f32 16.0, %v157_v1  ;;  %v43_v12 = vrot.slane %v42_v11, 2  ;;  %vm52_vm1 = vweird.f32 %v157_v1 }
  0x11   :  { %v49_v8 = vsub.f32 1.0, %v48_v6  ;;  %v44_v14 = vadd.f32 %v43_v12, %v42_v11 }
  0x13   :  { %v50_v10 = vmul.f32 %v157_v1, %v49_v8  ;;  %v45_v15 = vrot.slane %v44_v14, 1 }
  0x15   :  { %v51_v13 = vadd.f32 %v157_v1, %v50_v10  ;;  %v46_v17 = vadd.f32 %v45_v15, %v44_v14 }
  0x17   :  { %v53_v16 = vsel %vm52_vm1, %v157_v1, %v51_v13 }
  0x18   :  { %v54_v18 = vmul.f32 %v53_v16, %v46_v17 }
  0x1a   :  { %v55_v19 = vsub.f32 %v35_v2, %v54_v18  ;;  %v56_v20 = vsub.f32 %v36_v3, %v54_v18  ;;  %v102_v32 = vmul.f32 0.1, %v54_v18 }
  0x1c   :  { %v57_v21 = vmul.f32 %v55_v19, %v55_v19  ;;  %v58_v22 = vmul.f32 %v56_v20, %v56_v20  ;;  %v103_v34 = vadd.f32 %v102_v32, %v101_v31 }
  0x1e   :  { %v59_v23 = vsel %vm37_vm0, %v57_v21, 0.0  ;;  %v60_v24 = vsel %vm37_vm0, %v58_v22, 0.0  ;;  %104 = vst.msk [vmem:[%s325_s5] sm:$0x1] %vm98_vm2, %v103_v34 }
  0x1f   :  { %v61_v25 = vadd.f32 %v60_v24, %v59_v23 }
  0x21   :  { %v62_v26 = vrot.slane %v61_v25, 4 }
  0x23   :  { %v63_v27 = vadd.f32 %v62_v26, %v61_v25 }
  0x25   :  { %v64_v28 = vrot.slane %v63_v27, 2 }
  0x27   :  { %v65_v30 = vadd.f32 %v64_v28, %v63_v27 }
  0x29   :  { %v66_v33 = vrot.slane %v65_v30, 1 }
  0x2b   :  { %v67_v36 = vadd.f32 %v66_v33, %v65_v30 }
  0x2d   :  { %v68_v37 = vmul.f32 0.06666667, %v67_v36 }
  0x2f   :  { %v69_v39 = vadd.f32 1e-05, %v68_v37  ;;  %v107_v40 = vmul.f32 0.1, %v68_v37 }
  0x31   :  { %158 = vrsqrt.f32 %v69_v39  ;;  %v108_v42 = vadd.f32 %v107_v40, %v106_v38  ;;  %vm76_vm3 = vweird.f32 %v69_v39 }
  0x32   :  { %160 = vlog2.f32 %v69_v39 }
  0x33   :  { %109 = vst.msk [vmem:[%s325_s5 + $0x1] sm:$0x1] %vm98_vm2, %v108_v42  ;;  %162 = vpow2.f32 %v82_v43 }
  0x37   :  { %v159_v44 = vpop.eup %158 }
  0x38   :  { %v161_v45 = vpop.eup %160  ;;  %v71_v46 = vmul.f32 %v159_v44, %v69_v39  ;;  %vm77_vm4 = vweird.f32 %v159_v44 }
  0x39   :  { %v95_v47 = vmul.f32 0.6931472, %v161_v45  ;;  %v163_v52 = vpop.eup %162  ;;  %vm78_vm5 = vmor %vm76_vm3, %vm77_vm4 }
  0x3a   :  { %v72_v48 = vmul.f32 %v159_v44, %v71_v46  ;;  %v86_v55 = vperm.slane %v163_v52, 0 }
  0x3b   :  { %v96_v49 = vmul.f32 0.5, %v95_v47 }
  0x3c   :  { %v73_v50 = vmul.f32 0.5, %v72_v48 }
  0x3d   :  { %v97_v51 = vsub.f32 %v80_v41, %v96_v49 }
  0x3e   :  { %v74_v53 = vsub.f32 1.5, %v73_v50 }
  0x3f   :  { %99 = vst.msk [vmem:[#allocation6] sm:$0x1] %vm98_vm2, %v97_v51 }
  0x40   :  { %v75_v54 = vmul.f32 %v159_v44, %v74_v53  ;;  %133 = dma.vmem_to_hbm [thread:$0]  %s129_s9, 16, %s131_s12, [#allocation7]  }
  0x42   :  { %v79_v56 = vsel %vm78_vm5, %v159_v44, %v75_v54 }
  0x43   :  { %v84_v57 = vmul.f32 %v79_v56, %v55_v19  ;;  %v85_v59 = vmul.f32 %v79_v56, %v56_v20 }
  0x45   :  { %v87_v60 = vmul.f32 %v86_v55, %v84_v57  ;;  %v88_v61 = vmul.f32 %v86_v55, %v85_v59 }
  0x47   :  { %v90_v62 = vadd.f32 %v155_v58, %v87_v60  ;;  %v91_v63 = vadd.f32 %v155_v58, %v88_v61 }
  0x49   :  { %92 = vst.msk [vmem:[#allocation5] sm:$0xff] %vm37_vm0, %v90_v62 }
  0x4a   :  { %93 = vst.msk [vmem:[#allocation5 + $0x8] sm:$0xff] %vm37_vm0, %v91_v63 }
  0x4b   :  { %122 = dma.vmem_to_hbm [thread:$0]  %s115_s14, 256, %s117_s17, [#allocation4], %s243_s23, %s243_s23, %s244_s24  }
  0x4c   :  { %238 = dma.done.wait [#allocation4], 256  }
  0x4d   :  { %239 = vsyncadd [#allocation4], 4294967040 }
  0x4e   :  { %240 = dma.done.wait [#allocation7], 16  }
  0x4f   :  { %241 = vsyncadd [#allocation7], 4294967280 }
  0x50   :  { %146 = vsyncpa [#allocation3], 1 }
  0x51   :  { %147 = vsyncpa [#allocation4], 1 }
  0x52   :  { %148 = vsyncpa [#allocation7], 1 }

</bundles_post_ra>
